<compile_context>
chip_gen: v7x
topology: tpu7x:2x2x1
jax: 0.10.0
libtpu: 0.0.40
codegen_flags: <defaults>
</compile_context>

<pallas_src>
import functools

import jax
import jax.numpy as jnp
from jax.experimental import pallas as pl
from jax.experimental.pallas import tpu as pltpu


_MAX_OUTSTANDING_DMAS = 4            # 2-4 in-flight copies hide DMA latency
_TARGET_CHUNK_BYTES = 4 * 1024 * 1024


def _lane_dense_2d(total: int) -> tuple[int, int]:
    """Factor `total` elements into (rows, lanes) with a lane-dense last dim.

    Only shapes the DMA descriptors; no VMEM tiles exist on this path, so even
    the (total, 1) fallback cannot exceed any scoped-VMEM limit.
    """
    for lanes in (8192, 4096, 2048, 1024, 512, 256, 128):
        if total % lanes == 0:
            return total // lanes, lanes
    return total, 1


def _plan_chunks(rows: int, row_bytes: int) -> list[tuple[int, int]]:
    """Split [0, rows) into a few near-equal contiguous (start, size) chunks."""
    by_size = -(-(rows * row_bytes) // _TARGET_CHUNK_BYTES)   # ceil-div
    n = max(1, min(_MAX_OUTSTANDING_DMAS, by_size, rows))
    base, rem = divmod(rows, n)
    chunks, start = [], 0
    for i in range(n):
        size = base + (1 if i < rem else 0)
        if size > 0:
            chunks.append((start, size))
            start += size
    return chunks


def _make_copy_kernel(chunks):
    """HBM->HBM memcpy: issue all chunk DMAs (overlapped), then wait on all."""
    def kernel(x_hbm, o_hbm, sems):
        copies = []
        for i, (r0, nr) in enumerate(chunks):        # static starts / sizes
            cp = pltpu.make_async_copy(
                x_hbm.at[pl.ds(r0, nr)], o_hbm.at[pl.ds(r0, nr)], sems.at[i])
            cp.start()
            copies.append(cp)
        for cp in copies:
            cp.wait()
    return kernel


def _make_inplace_kernel(lead_rows):
    """Donated/aliased path: output buffer already holds the input bits.

    A single tiny self-copy of the leading rows gives the output ref an
    explicit write (so nothing is dead-code-eliminated) while moving O(slice),
    not O(array), bytes.
    """
    def kernel(x_hbm, o_hbm, sem):
        cp = pltpu.make_async_copy(
            x_hbm.at[pl.ds(0, lead_rows)], o_hbm.at[pl.ds(0, lead_rows)], sem)
        cp.start()
        cp.wait()
    return kernel


@jax.jit
def _identity_copy(x):
    """Out-of-place identity: x preserved, output is a fresh buffer."""
    orig_shape = x.shape
    total = x.size
    itemsize = jnp.dtype(x.dtype).itemsize
    rows, lanes = _lane_dense_2d(total)
    chunks = _plan_chunks(rows, lanes * itemsize)
    x2d = x.reshape(rows, lanes)                     # free bitcast under jit
    out2d = pl.pallas_call(
        _make_copy_kernel(chunks),
        out_shape=jax.ShapeDtypeStruct((rows, lanes), x.dtype),
        in_specs=[pl.BlockSpec(memory_space=pl.ANY)],    # raw HBM refs
        out_specs=pl.BlockSpec(memory_space=pl.ANY),
        scratch_shapes=[pltpu.SemaphoreType.DMA((len(chunks),))],
        cost_estimate=pl.CostEstimate(
            flops=0, transcendentals=0, bytes_accessed=2 * total * itemsize),
    )(x2d)
    return out2d.reshape(orig_shape)


@functools.partial(jax.jit, donate_argnums=0)
def _identity_inplace(x):
    """Donated identity: x's buffer is aliased straight through (~zero bytes)."""
    orig_shape = x.shape
    total = x.size
    rows, lanes = _lane_dense_2d(total)
    x2d = x.reshape(rows, lanes)
    out2d = pl.pallas_call(
        _make_inplace_kernel(min(8, rows)),
        out_shape=jax.ShapeDtypeStruct((rows, lanes), x.dtype),
        in_specs=[pl.BlockSpec(memory_space=pl.ANY)],
        out_specs=pl.BlockSpec(memory_space=pl.ANY),
        scratch_shapes=[pltpu.SemaphoreType.DMA(())],
        input_output_aliases={0: 0},                 # bound to the donated buffer
        cost_estimate=pl.CostEstimate(
            flops=0, transcendentals=0, bytes_accessed=0),
    )(x2d)
    return out2d.reshape(orig_shape)


def identity(x: jax.Array, *, donate: bool = False) -> jax.Array:
    """Forward pass of nn.Identity (same shape, dtype, values).

    NOTE: the truly optimal identity is `return x` (zero bytes moved); a kernel
    launch is kept because the exercise requires one.
      donate=False (default): out-of-place HBM->HBM DMA copy; x is preserved.
      donate=True : x's buffer is donated and aliased to the output; the kernel
                    moves ~zero bytes.  Only use if x is not needed afterwards.
    """
    if x.ndim == 0 or x.size == 0:
        return x   # nothing a DMA kernel can improve on for degenerate shapes
    if donate:
        return _identity_inplace(x)
    return _identity_copy(x)


if __name__ == "__main__":
    key = jax.random.PRNGKey(0)
    x = jax.random.normal(key, (2, 4, 16, 16), dtype=jnp.float32)  # NCHW
    x_ref_copy = jnp.array(x)   # pristine copy for correctness checks

    # Default (non-donated) path: plain DMA copy, input preserved.
    y = jax.block_until_ready(identity(x))
    assert y.shape == x_ref_copy.shape, f"shape mismatch: {y.shape}"
    assert y.dtype == x_ref_copy.dtype, f"dtype mismatch: {y.dtype}"
    assert bool(jnp.all(y == x_ref_copy)), "identity output differs from input"
    assert bool(jnp.all(x == x_ref_copy)), "input was clobbered on copy path"

    # Donated / in-place path: buffer aliased through, ~zero bytes moved.
    x2 = jnp.array(x_ref_copy)
    y2 = jax.block_until_ready(identity(x2, donate=True))
    assert y2.shape == x_ref_copy.shape and y2.dtype == x_ref_copy.dtype
    assert bool(jnp.all(y2 == x_ref_copy)), "donated identity output differs"

    print("KERNEL_OK")
</pallas_src>

<mosaic_0001>
module attributes {stable_mosaic.version = 11 : i64} {
  func.func @kernel(%arg0: memref<1x2048xf32, #tpu.memory_space<any>>, %arg1: memref<1x2048xf32, #tpu.memory_space<any>>, %arg2: memref<1x!tpu.dma_semaphore, #tpu.memory_space<semaphore_mem>>) attributes {dimension_semantics = [], scalar_prefetch = 0 : i64, scratch_operands = 1 : i64, tpu.core_type = #tpu.core_type<tc>} {
    %c0_i32 = arith.constant 0 : i32
    %c0_i32_0 = arith.constant 0 : i32
    %c0_i32_1 = arith.constant 0 : i32
    %0 = tpu.memref_slice %arg0[%c0_i32_0, %c0_i32_1] : memref<1x2048xf32, #tpu.memory_space<any>> -> memref<1x2048xf32, #tpu.memory_space<any>>
    %c0_i32_2 = arith.constant 0 : i32
    %c0_i32_3 = arith.constant 0 : i32
    %1 = tpu.memref_slice %arg1[%c0_i32_2, %c0_i32_3] : memref<1x2048xf32, #tpu.memory_space<any>> -> memref<1x2048xf32, #tpu.memory_space<any>>
    %2 = tpu.memref_slice %arg2[%c0_i32] : memref<1x!tpu.dma_semaphore, #tpu.memory_space<semaphore_mem>> -> memref<1x!tpu.dma_semaphore, #tpu.memory_space<semaphore_mem>>
    %3 = tpu.memref_squeeze %2 : memref<1x!tpu.dma_semaphore, #tpu.memory_space<semaphore_mem>> -> memref<!tpu.dma_semaphore, #tpu.memory_space<semaphore_mem>>
    tpu.enqueue_dma source(%0 : memref<1x2048xf32, #tpu.memory_space<any>>) target(%1 : memref<1x2048xf32, #tpu.memory_space<any>>) target_semaphore(%3 : memref<!tpu.dma_semaphore, #tpu.memory_space<semaphore_mem>>)
    %c0_i32_4 = arith.constant 0 : i32
    %c0_i32_5 = arith.constant 0 : i32
    %c0_i32_6 = arith.constant 0 : i32
    %4 = tpu.memref_slice %arg0[%c0_i32_5, %c0_i32_6] : memref<1x2048xf32, #tpu.memory_space<any>> -> memref<1x2048xf32, #tpu.memory_space<any>>
    %c0_i32_7 = arith.constant 0 : i32
    %c0_i32_8 = arith.constant 0 : i32
    %5 = tpu.memref_slice %arg1[%c0_i32_7, %c0_i32_8] : memref<1x2048xf32, #tpu.memory_space<any>> -> memref<1x2048xf32, #tpu.memory_space<any>>
    %6 = tpu.memref_slice %arg2[%c0_i32_4] : memref<1x!tpu.dma_semaphore, #tpu.memory_space<semaphore_mem>> -> memref<1x!tpu.dma_semaphore, #tpu.memory_space<semaphore_mem>>
    %7 = tpu.memref_squeeze %6 : memref<1x!tpu.dma_semaphore, #tpu.memory_space<semaphore_mem>> -> memref<!tpu.dma_semaphore, #tpu.memory_space<semaphore_mem>>
    tpu.wait_dma2 semaphore(%7 : memref<!tpu.dma_semaphore, #tpu.memory_space<semaphore_mem>>) src(%4 : memref<1x2048xf32, #tpu.memory_space<any>>) dst(%5 : memref<1x2048xf32, #tpu.memory_space<any>>)
    return
  }
}

</mosaic_0001>

<bundles_post_ra>
// kernel: _identity_copy.1
= control target key start
LH: loop header
LB: loop body
LE: loop exit
PB: predicated region body
PF: predicated region fallthrough
CT: control target
= control target key end

     0   :  { %s92_s0 = inlined_call_operand.vmem [shape: f32[1,2048], index: 0, kind: input, shape index: {}]   ;;  %s93_s1 = inlined_call_operand.vmem [shape: f32[1,2048], index: 1, kind: output, shape index: {}]  }
   0x1   :  { %v38_v0 = vld [vmem:[%s92_s0] sm:$0xff]  ;;  %v40_v1 = vld [vmem:[%s92_s0 + $0x8] sm:$0xff] }
   0x2   :  { %39 = vst [vmem:[%s93_s1] sm:$0xff] %v38_v0  ;;  %41 = vst [vmem:[%s93_s1 + $0x8] sm:$0xff] %v40_v1 }
   0x3   :  { %49 = vsyncadd [#allocation2], 256 }
   0x4   :  { %68 = dma.done.wait [#allocation2], 256 }
   0x5   :  { %69 = vsyncadd [#allocation2], 4294967040 }
   0x6   :  { %53 = vsyncmov [#allocation2] }
   0x9   :  { %s54_s14 = vpop.sfrf %53 }
   0xa   :  { %p67_p0 = scmp.ne.s32.totalorder %s54_s14, 0 }
   0xc   :  { %58 = shalt.err (%p67_p0)  }

</bundles_post_ra>
